<compile_context>
chip_gen: v7x
topology: tpu7x:2x2x1
jax: 0.10.0
libtpu: 0.0.40
codegen_flags: <defaults>
</compile_context>

<pallas_src>
import math

import jax
import jax.numpy as jnp
from jax.experimental import pallas as pl
from jax.experimental.pallas import tpu as pltpu

_LANE = 128
_TARGET_TILE_BYTES = 2 * 1024 * 1024  # ~2 MiB per tile -> ~86%+ of HBM roofline


def _swish_kernel(x_ref, o_ref):
    # f32 math: exp/logistic on the EUP slot, multiply on the VPU slot; both are
    # hidden under the HBM DMA for this memory-bound kernel.
    x = x_ref[...].astype(jnp.float32)
    o_ref[...] = (x * jax.nn.sigmoid(x)).astype(o_ref.dtype)


def _round_up(a, b):
    return ((a + b - 1) // b) * b


def _sublane_multiple(dtype):
    # 8 sublanes for 32-bit, 16 for 16-bit, 32 for 8-bit (sub-32-bit packs along sublanes).
    itemsize = jnp.dtype(dtype).itemsize
    return max(8, 32 // max(itemsize, 1))


def _dimension_semantics():
    # v7x has 2 TensorCores per chip with independent DMA paths to HBM; shard the
    # grid across them.  On single-TC chips keep plain "parallel".
    try:
        kind = jax.devices()[0].device_kind.lower()
    except Exception:
        kind = ""
    if "v7" in kind:
        return (pltpu.CORE_PARALLEL,)
    return ("parallel",)


def swish_pallas(x):
    """Elementwise Swish/SiLU: y = x * sigmoid(x); same shape & dtype as x."""
    orig_shape = x.shape
    dtype = x.dtype
    itemsize = jnp.dtype(dtype).itemsize
    total = math.prod(orig_shape) if orig_shape else 1
    sub = _sublane_multiple(dtype)

    flat = x.reshape(total)

    # --- Lane-dense slab without any pad/slice copy whenever sizes allow. ---
    tn = None
    if total >= _LANE and total % _LANE == 0:
        for cand in (1024, 512, 256, _LANE):
            if total % cand == 0:
                tn = cand
                break

    if tn is not None:
        padded_total = total  # fast path: pure reshape (free, no HBM copy)
    else:
        # Genuinely ragged size: pad once; swish(0) == 0 so zero padding is safe.
        tn = 1024 if total >= 1024 else _LANE
        padded_total = _round_up(total, tn)
        flat = jnp.pad(flat, (0, padded_total - total))

    rows = padded_total // tn
    x2d = flat.reshape(rows, tn)

    # Row tile: ~2 MiB per tile, rounded to the dtype's sublane packing.  The grid
    # may have a ragged last block (masked stores) instead of padding rows.
    tm = max(sub, (_TARGET_TILE_BYTES // (tn * itemsize)) // sub * sub)
    tm_eff = rows if tm >= rows else tm  # full-dim block is always legal
    grid = (pl.cdiv(rows, tm_eff),)

    # VMEM footprint: in + out tiles, double-buffered.  Only raise the scoped
    # limit if we'd exceed v5e's 16 MiB default (keeps headroom on v7x's 64 MiB).
    vmem_bytes = 2 * 2 * tm_eff * tn * itemsize
    cp_kwargs = dict(dimension_semantics=_dimension_semantics())
    if vmem_bytes > 14 * 1024 * 1024:
        cp_kwargs["vmem_limit_bytes"] = min(vmem_bytes + (2 << 20), 32 * 1024 * 1024)

    out2d = pl.pallas_call(
        _swish_kernel,
        out_shape=jax.ShapeDtypeStruct((rows, tn), dtype),
        grid=grid,
        in_specs=[pl.BlockSpec((tm_eff, tn), lambda i: (i, 0))],
        out_specs=pl.BlockSpec((tm_eff, tn), lambda i: (i, 0)),
        compiler_params=pltpu.CompilerParams(**cp_kwargs),
        cost_estimate=pl.CostEstimate(
            flops=5 * total,
            transcendentals=total,
            bytes_accessed=2 * total * itemsize),
    )(x2d)

    if padded_total != total:
        return out2d.reshape(padded_total)[:total].reshape(orig_shape)
    return out2d.reshape(orig_shape)


if __name__ == "__main__":
    key = jax.random.PRNGKey(0)
    batch, seq, hidden = 2, 8, 32
    x = jax.random.normal(key, (batch, seq, hidden), dtype=jnp.float32)

    y = jax.block_until_ready(swish_pallas(x))

    # Reference: exactly the PyTorch module's forward, in plain JAX.
    y_ref = x * jax.nn.sigmoid(x)
    assert y.shape == x.shape and y.dtype == x.dtype
    assert jnp.allclose(y, y_ref, atol=1e-5, rtol=1e-5)

    # Also exercise the ragged (pad) fallback path once with an awkward size.
    x2 = jax.random.normal(jax.random.PRNGKey(1), (3, 5, 7), dtype=jnp.float32)
    y2 = jax.block_until_ready(swish_pallas(x2))
    assert jnp.allclose(y2, x2 * jax.nn.sigmoid(x2), atol=1e-5, rtol=1e-5)

    print("KERNEL_OK")
</pallas_src>

<mosaic_0001>
module attributes {stable_mosaic.version = 11 : i64} {
  func.func @_swish_kernel(%arg0: i32, %arg1: memref<1x512xf32, #tpu.memory_space<vmem>>, %arg2: memref<1x512xf32, #tpu.memory_space<vmem>>) attributes {dimension_semantics = [#tpu.dimension_semantics<parallel>], iteration_bounds = array<i64: 1>, scalar_prefetch = 0 : i64, scratch_operands = 0 : i64, tpu.core_type = #tpu.core_type<tc>, window_params = [{transform_indices = @transform_0, window_bounds = array<i64: 1, 512>}, {transform_indices = @transform_1, window_bounds = array<i64: 1, 512>}]} {
    %c0 = arith.constant 0 : index
    %c0_0 = arith.constant 0 : index
    %0 = vector.load %arg1[%c0, %c0_0] : memref<1x512xf32, #tpu.memory_space<vmem>>, vector<1x512xf32>
    %1 = arith.negf %0 : vector<1x512xf32>
    %2 = math.exp %1 : vector<1x512xf32>
    %cst = arith.constant 1.000000e+00 : f32
    %3 = vector.broadcast %cst : f32 to vector<1x512xf32>
    %4 = arith.addf %3, %2 : vector<1x512xf32>
    %5 = arith.divf %3, %4 : vector<1x512xf32>
    %6 = arith.mulf %0, %5 : vector<1x512xf32>
    %c0_1 = arith.constant 0 : index
    %c0_2 = arith.constant 0 : index
    %7 = vector.load %arg2[%c0_1, %c0_2] : memref<1x512xf32, #tpu.memory_space<vmem>>, vector<1x512xf32>
    tpu.vector_store %arg2[%c0_1, %c0_2], %6 {strides = array<i32>} : memref<1x512xf32, #tpu.memory_space<vmem>>, vector<1x512xf32>,
    return
  }
  func.func @transform_0(%arg0: i32) -> (i32, i32) {
    %c0_i32 = arith.constant 0 : i32
    %c0_i32_0 = arith.constant 0 : i32
    return %arg0, %c0_i32 : i32, i32
  }
  func.func @transform_1(%arg0: i32) -> (i32, i32) {
    %c0_i32 = arith.constant 0 : i32
    %c0_i32_0 = arith.constant 0 : i32
    return %arg0, %c0_i32 : i32, i32
  }
}

</mosaic_0001>

<bundles_post_ra>
// kernel: tpu_custom_call.1
= control target key start
LH: loop header
LB: loop body
LE: loop exit
PB: predicated region body
PF: predicated region fallthrough
CT: control target
= control target key end

     0   :  { %6 = vsyncpa [#allocation3], 0  ;;  %s140_s0 = inlined_call_operand.hbm [shape: f32[1,512], index: 0, kind: input, shape index: {}]   ;;  %s141_s1 = inlined_call_operand.hbm [shape: f32[1,512], index: 1, kind: output, shape index: {}]  }
   0x1   :  { %7 = vsyncpa [#allocation4], 0  ;;  %s104_s6 = smov [#allocation2]   ;;  %s56_s10 = scalar_lea.hbm %s140_s0, 64 }
   0x2   :  { %s14_s7 = sshll.u32 %s104_s6, 4  ;;  %p57_p0 = scmp.ne.s32.totalorder %s140_s0, %s56_s10  ;;  %s15_s7 = int_to_ptr.vmem [resolvable:$true] %s14_s7 }
   0x3   :  { %p60_p1 = scmp.lt.u32.totalorder %s56_s10, %s140_s0 }
   0x5   :  { %p62_p2 = pnand %p60_p1, %p57_p0 }
   0x7   :  { %65 = shalt.err (!%p62_p2)
}
   0x8   :  { %s66_s15 = scalar_lea.vmem %s15_s7, 64  ;;  %p71_p4 = scmp.lt.s32.totalorder %s15_s7, %s15_s7 }
   0x9   :  { %p67_p3 = scmp.ne.s32.totalorder %s15_s7, %s66_s15  ;;  %p72_p5 = scmp.lt.s32.totalorder %s66_s15, %s66_s15 }
   0xb   :  { %p73_p6 = por %p72_p5, %p71_p4 }
   0xd   :  { %p74_p7 = pnand %p73_p6, %p67_p3 }
   0xf   :  { %77 = shalt.err (!%p74_p7)
}
  0x10   :  { %17 = dma.hbm_to_vmem [thread:$0]  %s140_s0, 64, %s15_s7, [#allocation3]  }
  0x11   :  { %100 = dma.done.wait [#allocation3], 64  }
  0x12   :  { %101 = vsyncadd [#allocation3], 4294967232  ;;  %v21_v0 = vld [vmem:[#allocation2] sm:$0xf]  ;;  %v29_v4 = vlaneseq  ;;  %s105_s18 = smov [#allocation5]  }
  0x13   :  { %v49_v1 = vmul.f32 -1.442695, %v21_v0  ;;  %s40_s19 = sshll.u32 %s105_s18, 4  ;;  %s41_s19 = int_to_ptr.vmem [resolvable:$true] %s40_s19 }
  0x14   :  { %vm31_vm0 = vcmp.lt.s32.totalorder %v29_v4, 512  ;;  %s78_s20 = scalar_lea.vmem %s41_s19, 64  ;;  %p83_p9 = scmp.lt.s32.totalorder %s41_s19, %s41_s19 }
  0x15   :  { %52 = vpow2.f32 %v49_v1  ;;  %p79_p8 = scmp.ne.s32.totalorder %s41_s19, %s78_s20  ;;  %p84_p10 = scmp.lt.s32.totalorder %s78_s20, %s78_s20 }
  0x17   :  { %p85_p11 = por %p84_p10, %p83_p9 }
  0x19   :  { %p86_p12 = pnand %p85_p11, %p79_p8 }
  0x1f   :  { %v53_v2 = vpop.eup %52 }
  0x20   :  { %v25_v3 = vadd.f32 1.0, %v53_v2 }
  0x22   :  { %54 = vrcp.f32 %v25_v3 }
  0x2c   :  { %v55_v5 = vpop.eup %54 }
  0x2d   :  { %v28_v6 = vmul.f32 %v55_v5, %v21_v0 }
  0x2f   :  { %33 = vst.msk [vmem:[#allocation5] sm:$0xf] %vm31_vm0, %v28_v6 }
  0x30   :  { %89 = shalt.err (!%p86_p12)
}
  0x31   :  { %s90_s22 = scalar_lea.hbm %s141_s1, 64 }
  0x32   :  { %p91_p13 = scmp.ne.s32.totalorder %s141_s1, %s90_s22  ;;  %p94_p0 = scmp.lt.u32.totalorder %s90_s22, %s141_s1 }
  0x34   :  { %p96_p1 = pnand %p94_p0, %p91_p13 }
  0x36   :  { %99 = shalt.err (!%p96_p1)
}
  0x37   :  { %43 = dma.vmem_to_hbm [thread:$0]  %s41_s19, 64, %s141_s1, [#allocation4]  }
  0x38   :  { %102 = dma.done.wait [#allocation4], 64  }
  0x39   :  { %103 = vsyncadd [#allocation4], 4294967232 }
  0x3a   :  { %47 = vsyncpa [#allocation3], 1 }
  0x3b   :  { %48 = vsyncpa [#allocation4], 1 }

</bundles_post_ra>
